<compile_context>
chip_gen: v7x
topology: tpu7x:2x2x1
jax: 0.10.0
libtpu: 0.0.40
codegen_flags: <defaults>
</compile_context>

<pallas_src>
import functools

import jax
import jax.numpy as jnp
from jax.experimental import pallas as pl
from jax.experimental.pallas import tpu as pltpu


# ------------------------------ in-kernel GELU -------------------------------
def _gelu(x, approximate):
    if approximate == "tanh":
        c = jnp.float32(0.7978845608028654)  # sqrt(2/pi)
        return 0.5 * x * (1.0 + jnp.tanh(c * (x + 0.044715 * x * x * x)))
    # F.gelu(x, approximate="none") == 0.5*x*(1 + erf(x/sqrt(2)))
    inv_sqrt2 = jnp.float32(0.7071067811865476)
    return 0.5 * x * (1.0 + jax.lax.erf(x * inv_sqrt2))


# x[(tm, tk)] contracted with w[(tn, tk)] over their last axes (i.e. x @ w^T).
_TRANS_B = (((1,), (1,)), ((), ()))


# ------------------------------- Pallas kernels ------------------------------
def geglu_kernel(x_ref, w1_ref, w2_ref, b1_ref, b2_ref, g_ref, o_ref, *, approximate):
    """Single-K-pass variant: grid = (M//tm, N//tn); full K resident per step."""
    x = x_ref[...]
    acc1 = jax.lax.dot_general(x, w1_ref[...], _TRANS_B,
                               preferred_element_type=jnp.float32)
    acc2 = jax.lax.dot_general(x, w2_ref[...], _TRANS_B,
                               preferred_element_type=jnp.float32)
    g = g_ref[...]                              # (1, tn) group-expanded width gate
    h1 = (acc1 + b1_ref[...]) * g               # first proj half, width-gated
    h2 = (acc2 + b2_ref[...]) * g               # second proj half, width-gated
    o_ref[...] = (h1 * _gelu(h2, approximate)).astype(o_ref.dtype)


def geglu_kernel_kloop(x_ref, w1_ref, w2_ref, b1_ref, b2_ref, g_ref, o_ref,
                       acc1_ref, acc2_ref, *, approximate):
    """K-reduction variant: grid = (M//tm, N//tn, K//tk); K last ('arbitrary')."""
    k = pl.program_id(2)

    @pl.when(k == 0)
    def _():
        acc1_ref[...] = jnp.zeros_like(acc1_ref)
        acc2_ref[...] = jnp.zeros_like(acc2_ref)

    x = x_ref[...]
    acc1_ref[...] += jax.lax.dot_general(x, w1_ref[...], _TRANS_B,
                                         preferred_element_type=jnp.float32)
    acc2_ref[...] += jax.lax.dot_general(x, w2_ref[...], _TRANS_B,
                                         preferred_element_type=jnp.float32)

    @pl.when(k == pl.num_programs(2) - 1)
    def _():
        g = g_ref[...]
        h1 = (acc1_ref[...] + b1_ref[...]) * g
        h2 = (acc2_ref[...] + b2_ref[...]) * g
        o_ref[...] = (h1 * _gelu(h2, approximate)).astype(o_ref.dtype)


# ---------------------------------- wrapper -----------------------------------
def _pick_tile(dim, target, quantum):
    """Largest multiple of `quantum` that divides `dim`, capped at `target`.
    Falls back to the full dimension (full-extent block) if no such multiple exists."""
    t = min(target, dim)
    t -= t % quantum
    while t >= quantum:
        if dim % t == 0:
            return t
        t -= quantum
    return dim


def gated_geglu(
    x,
    weight,        # (2*dim_out, dim_in) -- same layout as torch nn.Linear.weight
    bias,          # (2*dim_out,)
    gate,          # (gate_width,)       -- WidthGate parameter
    *,
    approximate="none",          # non-NPU torch branch uses exact GELU
    tm=256,
    tn=256,
    tk=512,
    collapse_k_threshold=2048,   # K <= this -> single full-K pass, no K grid axis
):
    orig_shape = x.shape
    dim_in = orig_shape[-1]
    n2, k_w = weight.shape
    assert k_w == dim_in, "weight must be (2*dim_out, dim_in)"
    assert n2 % 2 == 0, "proj output dim must be even (2*dim_out)"
    dim_out = n2 // 2
    gate_width = gate.shape[0]
    assert dim_out % gate_width == 0, "dim_out must be divisible by gate_width"

    x2 = x.reshape(-1, dim_in)
    M, K = x2.shape
    N = dim_out

    # Keep weights in the compute dtype (no-op when the model already stores them that
    # way; bf16 x + bf16 weights feed the v6e/v7x MXU at full rate, accumulation is f32).
    w = weight if weight.dtype == x2.dtype else weight.astype(x2.dtype)

    tm = _pick_tile(M, tm, 8)
    tn = _pick_tile(N, tn, 128)
    use_k_axis = K > collapse_k_threshold
    tk = _pick_tile(K, tk, 128) if use_k_axis else K

    assert M % tm == 0 and N % tn == 0 and K % tk == 0
    assert (tm % 8 == 0) or tm == M
    assert (tn % 128 == 0) or tn == N
    assert tn % 8 == 0, "dim_out must be a multiple of 8 for the weight block layout"
    assert (tk % 128 == 0) or tk == K

    # Tiny O(dim_out) parameter glue: bias halves + group-expanded width gate, f32 rows.
    b1_row = bias[:dim_out].reshape(1, N).astype(jnp.float32)
    b2_row = bias[dim_out:].reshape(1, N).astype(jnp.float32)
    g_row = jnp.repeat(gate, dim_out // gate_width).reshape(1, N).astype(jnp.float32)

    nj_half = N // tn   # block-row offset of the second weight half

    # Explicit VMEM budget (double-buffered x / w1 / w2 / out + accumulators).
    itemsize = x2.dtype.itemsize
    est = 2 * (tm * tk + 2 * tn * tk) * itemsize
    est += 2 * tm * tn * x2.dtype.itemsize
    est += (2 * tm * tn * 4) if use_k_axis else 0
    vmem_limit = int(min(64 * 1024 * 1024, max(32 * 1024 * 1024, est * 1.5)))

    if not use_k_axis:
        grid = (M // tm, N // tn)
        grid_spec = pltpu.PrefetchScalarGridSpec(
            num_scalar_prefetch=0,
            grid=grid,
            in_specs=[
                pl.BlockSpec((tm, tk), lambda i, j: (i, 0)),              # x tile
                pl.BlockSpec((tn, tk), lambda i, j: (j, 0)),              # W rows, half 1
                pl.BlockSpec((tn, tk), lambda i, j: (j + nj_half, 0)),    # W rows, half 2
                pl.BlockSpec((1, tn), lambda i, j: (0, j)),               # bias half 1
                pl.BlockSpec((1, tn), lambda i, j: (0, j)),               # bias half 2
                pl.BlockSpec((1, tn), lambda i, j: (0, j)),               # expanded gate
            ],
            out_specs=pl.BlockSpec((tm, tn), lambda i, j: (i, j)),
        )
        kernel = functools.partial(geglu_kernel, approximate=approximate)
        dim_sem = ("parallel", "parallel")
    else:
        grid = (M // tm, N // tn, K // tk)
        grid_spec = pltpu.PrefetchScalarGridSpec(
            num_scalar_prefetch=0,
            grid=grid,
            in_specs=[
                pl.BlockSpec((tm, tk), lambda i, j, k: (i, k)),
                pl.BlockSpec((tn, tk), lambda i, j, k: (j, k)),
                pl.BlockSpec((tn, tk), lambda i, j, k: (j + nj_half, k)),
                pl.BlockSpec((1, tn), lambda i, j, k: (0, j)),
                pl.BlockSpec((1, tn), lambda i, j, k: (0, j)),
                pl.BlockSpec((1, tn), lambda i, j, k: (0, j)),
            ],
            out_specs=pl.BlockSpec((tm, tn), lambda i, j, k: (i, j)),
            scratch_shapes=[pltpu.VMEM((tm, tn), jnp.float32),
                            pltpu.VMEM((tm, tn), jnp.float32)],
        )
        kernel = functools.partial(geglu_kernel_kloop, approximate=approximate)
        dim_sem = ("parallel", "parallel", "arbitrary")

    out = pl.pallas_call(
        kernel,
        out_shape=jax.ShapeDtypeStruct((M, N), x.dtype),
        grid_spec=grid_spec,
        compiler_params=pltpu.CompilerParams(
            dimension_semantics=dim_sem,
            vmem_limit_bytes=vmem_limit,
        ),
    )(x2, w, w, b1_row, b2_row, g_row)          # weight passed twice: two DMA views

    return out.reshape(*orig_shape[:-1], dim_out)


# ------------------------------ pure-JAX reference ----------------------------
def gated_geglu_ref(x, weight, bias, gate, *, approximate="none"):
    dim_out = weight.shape[0] // 2
    gate_width = gate.shape[0]
    h = x @ weight.T + bias
    a, g = h[..., :dim_out], h[..., dim_out:]
    scale = jnp.repeat(gate, dim_out // gate_width)
    a = a * scale
    g = g * scale
    return (a * jax.nn.gelu(g, approximate=(approximate == "tanh"))).astype(x.dtype)


# ------------------------------------ main -------------------------------------
if __name__ == "__main__":
    def run_case(B, S, dim_in, dim_out, gate_width, key, **kwargs):
        kx, kwt, kb, kg = jax.random.split(key, 4)
        x = jax.random.normal(kx, (B, S, dim_in), dtype=jnp.float32)
        # nn.Linear(dim_in, 2*dim_out): weight (2*dim_out, dim_in), bias (2*dim_out,)
        weight = jax.random.normal(kwt, (2 * dim_out, dim_in), dtype=jnp.float32) * 0.02
        bias = jax.random.normal(kb, (2 * dim_out,), dtype=jnp.float32) * 0.01
        # WidthGate parameter (nominally init'd to ones; randomized to exercise gating).
        gate = jax.random.uniform(kg, (gate_width,), dtype=jnp.float32,
                                  minval=0.0, maxval=1.5)

        out = gated_geglu(x, weight, bias, gate, **kwargs)
        out = jax.block_until_ready(out)

        ref = gated_geglu_ref(x, weight, bias, gate,
                              approximate=kwargs.get("approximate", "none"))
        assert out.shape == (B, S, dim_out)
        err = jnp.max(jnp.abs(out - ref))
        assert jnp.allclose(out, ref, rtol=1e-4, atol=1e-4), f"max abs err = {err}"

    key = jax.random.PRNGKey(0)
    k1, k2 = jax.random.split(key)

    # Case 1: K collapsed (single full-K MXU pass per tile, no K axis / accumulators).
    run_case(2, 64, 256, 256, 32, k1)
    # Case 2: forces the K-reduction path (grid K extent 4) to exercise the acc loop.
    run_case(2, 32, 512, 128, 32, k2, tk=128, collapse_k_threshold=128)

    print("KERNEL_OK")
</pallas_src>

<mosaic_0001>
module attributes {stable_mosaic.version = 11 : i64} {
  func.func @geglu_kernel(%arg0: i32, %arg1: i32, %arg2: memref<128x256xf32, #tpu.memory_space<vmem>>, %arg3: memref<256x256xf32, #tpu.memory_space<vmem>>, %arg4: memref<256x256xf32, #tpu.memory_space<vmem>>, %arg5: memref<1x256xf32, #tpu.memory_space<vmem>>, %arg6: memref<1x256xf32, #tpu.memory_space<vmem>>, %arg7: memref<1x256xf32, #tpu.memory_space<vmem>>, %arg8: memref<128x256xf32, #tpu.memory_space<vmem>>) attributes {dimension_semantics = [#tpu.dimension_semantics<parallel>, #tpu.dimension_semantics<parallel>], iteration_bounds = array<i64: 1, 1>, scalar_prefetch = 0 : i64, scratch_operands = 0 : i64, tpu.core_type = #tpu.core_type<tc>, window_params = [{transform_indices = @transform_0, window_bounds = array<i64: 128, 256>}, {transform_indices = @transform_1, window_bounds = array<i64: 256, 256>}, {transform_indices = @transform_2, window_bounds = array<i64: 256, 256>}, {transform_indices = @transform_3, window_bounds = array<i64: 1, 256>}, {transform_indices = @transform_4, window_bounds = array<i64: 1, 256>}, {transform_indices = @transform_5, window_bounds = array<i64: 1, 256>}, {transform_indices = @transform_6, window_bounds = array<i64: 128, 256>}]} {
    %c0 = arith.constant 0 : index
    %c0_0 = arith.constant 0 : index
    %0 = vector.load %arg2[%c0, %c0_0] : memref<128x256xf32, #tpu.memory_space<vmem>>, vector<128x256xf32>
    %c0_1 = arith.constant 0 : index
    %c0_2 = arith.constant 0 : index
    %1 = vector.load %arg3[%c0_1, %c0_2] : memref<256x256xf32, #tpu.memory_space<vmem>>, vector<256x256xf32>
    %cst = arith.constant dense<0.000000e+00> : vector<128x256xf32>
    %2 = tpu.matmul %0, %1, %cst {dimension_numbers = #tpu.dot_dimension_numbers<[1], [1], [0], [0], [0, 0, 1, 0], [], []>} : vector<128x256xf32>, vector<256x256xf32>, vector<128x256xf32> -> vector<128x256xf32>
    %c0_3 = arith.constant 0 : index
    %c0_4 = arith.constant 0 : index
    %3 = vector.load %arg4[%c0_3, %c0_4] : memref<256x256xf32, #tpu.memory_space<vmem>>, vector<256x256xf32>
    %cst_5 = arith.constant dense<0.000000e+00> : vector<128x256xf32>
    %4 = tpu.matmul %0, %3, %cst_5 {dimension_numbers = #tpu.dot_dimension_numbers<[1], [1], [0], [0], [0, 0, 1, 0], [], []>} : vector<128x256xf32>, vector<256x256xf32>, vector<128x256xf32> -> vector<128x256xf32>
    %c0_6 = arith.constant 0 : index
    %c0_7 = arith.constant 0 : index
    %5 = vector.load %arg7[%c0_6, %c0_7] : memref<1x256xf32, #tpu.memory_space<vmem>>, vector<1x256xf32>
    %c0_8 = arith.constant 0 : index
    %c0_9 = arith.constant 0 : index
    %6 = vector.load %arg5[%c0_8, %c0_9] : memref<1x256xf32, #tpu.memory_space<vmem>>, vector<1x256xf32>
    %7 = vector.broadcast %6 : vector<1x256xf32> to vector<128x256xf32>
    %8 = arith.addf %2, %7 : vector<128x256xf32>
    %9 = vector.broadcast %5 : vector<1x256xf32> to vector<128x256xf32>
    %10 = arith.mulf %8, %9 : vector<128x256xf32>
    %c0_10 = arith.constant 0 : index
    %c0_11 = arith.constant 0 : index
    %11 = vector.load %arg6[%c0_10, %c0_11] : memref<1x256xf32, #tpu.memory_space<vmem>>, vector<1x256xf32>
    %12 = vector.broadcast %11 : vector<1x256xf32> to vector<128x256xf32>
    %13 = arith.addf %4, %12 : vector<128x256xf32>
    %14 = vector.broadcast %5 : vector<1x256xf32> to vector<128x256xf32>
    %15 = arith.mulf %13, %14 : vector<128x256xf32>
    %cst_12 = arith.constant 5.000000e-01 : f32
    %16 = vector.broadcast %cst_12 : f32 to vector<128x256xf32>
    %17 = arith.mulf %16, %15 : vector<128x256xf32>
    %cst_13 = arith.constant 0.707106769 : f32
    %18 = vector.broadcast %cst_13 : f32 to vector<128x256xf32>
    %19 = arith.mulf %15, %18 : vector<128x256xf32>
    %20 = math.erf %19 : vector<128x256xf32>
    %cst_14 = arith.constant 1.000000e+00 : f32
    %21 = vector.broadcast %cst_14 : f32 to vector<128x256xf32>
    %22 = arith.addf %21, %20 : vector<128x256xf32>
    %23 = arith.mulf %17, %22 : vector<128x256xf32>
    %24 = arith.mulf %10, %23 : vector<128x256xf32>
    %c0_15 = arith.constant 0 : index
    %c0_16 = arith.constant 0 : index
    %25 = vector.load %arg8[%c0_15, %c0_16] : memref<128x256xf32, #tpu.memory_space<vmem>>, vector<128x256xf32>
    tpu.vector_store %arg8[%c0_15, %c0_16], %24 {strides = array<i32>} : memref<128x256xf32, #tpu.memory_space<vmem>>, vector<128x256xf32>,
    return
  }
  func.func @transform_0(%arg0: i32, %arg1: i32) -> (i32, i32) {
    %c0_i32 = arith.constant 0 : i32
    %c0_i32_0 = arith.constant 0 : i32
    return %arg0, %c0_i32 : i32, i32
  }
  func.func @transform_1(%arg0: i32, %arg1: i32) -> (i32, i32) {
    %c0_i32 = arith.constant 0 : i32
    %c0_i32_0 = arith.constant 0 : i32
    return %arg1, %c0_i32 : i32, i32
  }
  func.func @transform_2(%arg0: i32, %arg1: i32) -> (i32, i32) {
    %c1_i32 = arith.constant 1 : i32
    %0 = arith.addi %arg1, %c1_i32 : i32
    %c0_i32 = arith.constant 0 : i32
    %c0_i32_0 = arith.constant 0 : i32
    return %0, %c0_i32 : i32, i32
  }
  func.func @transform_3(%arg0: i32, %arg1: i32) -> (i32, i32) {
    %c0_i32 = arith.constant 0 : i32
    %c0_i32_0 = arith.constant 0 : i32
    return %c0_i32, %arg1 : i32, i32
  }
  func.func @transform_4(%arg0: i32, %arg1: i32) -> (i32, i32) {
    %c0_i32 = arith.constant 0 : i32
    %c0_i32_0 = arith.constant 0 : i32
    return %c0_i32, %arg1 : i32, i32
  }
  func.func @transform_5(%arg0: i32, %arg1: i32) -> (i32, i32) {
    %c0_i32 = arith.constant 0 : i32
    %c0_i32_0 = arith.constant 0 : i32
    return %c0_i32, %arg1 : i32, i32
  }
  func.func @transform_6(%arg0: i32, %arg1: i32) -> (i32, i32) {
    %c0_i32 = arith.constant 0 : i32
    return %arg0, %arg1 : i32, i32
  }
}

</mosaic_0001>

<bundles_post_ra>
// kernel: tpu_custom_call.1
= control target key start
LH: loop header
LB: loop body
LE: loop exit
PB: predicated region body
PF: predicated region fallthrough
CT: control target
= control target key end

     0   :  { %11 = vsyncpa [#allocation3], 0  ;;  %s1603_s0 = inlined_call_operand.hbm [shape: f32[128,256], index: 0, kind: input, shape index: {}]   ;;  %s1604_s1 = inlined_call_operand.hbm [shape: f32[512,256], index: 1, kind: input, shape index: {}]   ;;  %s1605_s2 = inlined_call_operand.hbm [shape: f32[512,256], index: 2, kind: input, shape index: {}]   ;;  %s1606_s3 = inlined_call_operand.vmem [shape: f32[1,256], index: 3, kind: input, shape index: {}]   ;;  %s1607_s4 = inlined_call_operand.vmem [shape: f32[1,256], index: 4, kind: input, shape index: {}]   ;;  %s1608_s5 = inlined_call_operand.vmem [shape: f32[1,256], index: 5, kind: input, shape index: {}]   ;;  %s1609_s6 = inlined_call_operand.hbm [shape: f32[128,256], index: 6, kind: output, shape index: {}]  }
   0x1   :  { %12 = vsyncpa [#allocation6], 0 }
   0x2   :  { %13 = vsyncpa [#allocation4], 0  ;;  %s1192_s21 = smov [#allocation5]   ;;  %s1193_s23 = smov [#allocation2]  }
   0x3   :  { %s31_s22 = sshll.u32 %s1192_s21, 4  ;;  %s19_s24 = sshll.u32 %s1193_s23, 4  ;;  %s32_s22 = int_to_ptr.vmem [resolvable:$true] %s31_s22  ;;  %s1233_s24 = int_to_ptr.vmem [resolvable:$true] %s19_s24 }
   0x4   :  { %s1095_s27 = scalar_lea.hbm %s1604_s1, 8192  ;;  %s1097_s8 = scalar_lea.hbm %s1604_s1, 16384 }
   0x5   :  { %p1096_p0 = scmp.ne.s32.totalorder %s1604_s1, %s1095_s27  ;;  %p1098_p1 = scmp.lt.u32.totalorder %s1097_s8, %s1095_s27 }
   0x6   :  { %p1099_p2 = scmp.lt.u32.totalorder %s1095_s27, %s1604_s1 }
   0x8   :  { %p1100_p3 = por %p1099_p2, %p1098_p1 }
   0xa   :  { %p1101_p4 = pnand %p1100_p3, %p1096_p0 }
   0xc   :  { %1104 = shalt.err (!%p1101_p4)
}
   0xd   :  { %s1105_s11 = scalar_lea.vmem %s32_s22, 8192  ;;  %p1110_p6 = scmp.lt.s32.totalorder %s32_s22, %s32_s22 }
   0xe   :  { %p1106_p5 = scmp.ne.s32.totalorder %s32_s22, %s1105_s11  ;;  %p1111_p7 = scmp.lt.s32.totalorder %s1105_s11, %s1105_s11 }
  0x10   :  { %p1112_p8 = por %p1111_p7, %p1110_p6 }
  0x12   :  { %p1113_p9 = pnand %p1112_p8, %p1106_p5 }
  0x14   :  { %1116 = shalt.err (!%p1113_p9)
}
  0x15   :  { %s1194_s12 = smov 256   ;;  %s1195_s13 = smov 16  }
  0x16   :  { %37 = dma.hbm_to_vmem [thread:$0]  %s1604_s1, 8192, %s32_s22, [#allocation6], %s1194_s12, %s1194_s12, %s1195_s13  }
  0x17   :  { %s1117_s18 = scalar_lea.hbm %s1603_s0, 4096 }
  0x18   :  { %p1118_p10 = scmp.ne.s32.totalorder %s1603_s0, %s1117_s18  ;;  %p1121_p11 = scmp.lt.u32.totalorder %s1117_s18, %s1603_s0 }
  0x1a   :  { %p1123_p12 = pnand %p1121_p11, %p1118_p10 }
  0x1c   :  { %1126 = shalt.err (!%p1123_p12)
}
  0x1d   :  { %s1127_s25 = scalar_lea.vmem %s1233_s24, 4096  ;;  %p1132_p0 = scmp.lt.s32.totalorder %s1233_s24, %s1233_s24 }
  0x1e   :  { %p1128_p13 = scmp.ne.s32.totalorder %s1233_s24, %s1127_s25  ;;  %p1133_p1 = scmp.lt.s32.totalorder %s1127_s25, %s1127_s25 }
  0x20   :  { %p1134_p2 = por %p1133_p1, %p1132_p0 }
  0x22   :  { %p1135_p3 = pnand %p1134_p2, %p1128_p13 }
  0x24   :  { %1138 = shalt.err (!%p1135_p3)
}
  0x25   :  { %25 = dma.hbm_to_vmem [thread:$0]  %s1603_s0, 4096, %s1233_s24, [#allocation3], %s1194_s12, %s1194_s12, %s1195_s13  }
  0x26   :  { %s896_s28 = scalar_lea.hbm %s1605_s2, 8192  ;;  %s1196_s29 = smov [#allocation7]  }
  0x27   :  { %s48_s30 = sshll.u32 %s1196_s29, 4  ;;  %s1163_s9 = scalar_lea.hbm %s1605_s2, 16384  ;;  %s49_s30 = int_to_ptr.vmem [resolvable:$true] %s48_s30 }
  0x28   :  { %p1140_p4 = scmp.ne.s32.totalorder %s896_s28, %s1163_s9  ;;  %p1142_p5 = scmp.lt.u32.totalorder %s896_s28, %s1605_s2 }
  0x29   :  { %p1143_p6 = scmp.lt.u32.totalorder %s1163_s9, %s1163_s9  ;;  %p1145_p8 = scmp.lt.u32.totalorder %s1163_s9, %s896_s28 }
  0x2b   :  { %p1144_p7 = por %p1143_p6, %p1142_p5 }
  0x2d   :  { %p1146_p9 = por %p1145_p8, %p1144_p7 }
  0x2f   :  { %p1147_p10 = pnand %p1146_p9, %p1140_p4 }
  0x31   :  { %1150 = shalt.err (!%p1147_p10)
}
  0x32   :  { %s1151_s0 = scalar_lea.vmem %s49_s30, 8192  ;;  %p1156_p12 = scmp.lt.s32.totalorder %s49_s30, %s49_s30 }
  0x33   :  { %p1152_p11 = scmp.ne.s32.totalorder %s49_s30, %s1151_s0  ;;  %p1157_p13 = scmp.lt.s32.totalorder %s1151_s0, %s1151_s0 }
  0x35   :  { %p1158_p0 = por %p1157_p13, %p1156_p12 }
  0x37   :  { %p1159_p1 = pnand %p1158_p0, %p1152_p11 }
  0x39   :  { %1162 = shalt.err (!%p1159_p1)
}
  0x3a   :  { %54 = dma.hbm_to_vmem [thread:$0]  %s896_s28, 8192, %s49_s30, [#allocation6], %s1194_s12, %s1194_s12, %s1195_s13  }
  0x3b   :  { %1186 = dma.done.wait [#allocation3], 4096  }
  0x3c   :  { %1187 = vsyncadd [#allocation3], 4294963200 }
  0x3d   :  { %1188 = dma.done.wait [#allocation6], 16384  }
  0x3e   :  { %1189 = vsyncadd [#allocation6], 4294950912  ;;  %v169_v0 = vld [vmem:[#allocation7 + $0x8] sm:$0xff]  ;;  %v171_v1 = vld [vmem:[#allocation7 + $0x18] sm:$0xff] }
  0x3f   :  { %v168_v2 = vld [vmem:[#allocation7] sm:$0xff]  ;;  %v961_v3 = vpack.c.bf16 %v171_v1, %v169_v0  ;;  %v170_v4 = vld [vmem:[#allocation7 + $0x10] sm:$0xff]  ;;  %v173_v5 = vld [vmem:[#allocation7 + $0x28] sm:$0xff] }
  0x40   :  { %v175_v6 = vld [vmem:[#allocation7 + $0x38] sm:$0xff]  ;;  %v963_v7 = vpack.c.bf16 %v170_v4, %v168_v2  ;;  %v105_v9 = vld [vmem:[#allocation5 + $0x8] sm:$0xff]  ;;  %v172_v11 = vld [vmem:[#allocation7 + $0x20] sm:$0xff] }
  0x41   :  { %v965_v8 = vpack.c.bf16 %v175_v6, %v173_v5  ;;  %962 = vmatprep.subr.bf16.mxu1 %v961_v3  ;;  %v107_v10 = vld [vmem:[#allocation5 + $0x18] sm:$0xff]  ;;  %v104_v13 = vld [vmem:[#allocation5] sm:$0xff]  ;;  %v106_v14 = vld [vmem:[#allocation5 + $0x10] sm:$0xff] }
  0x42   :  { %964 = vmatpush1.bf16.xpose.msra.mxu1 %v963_v7  ;;  %v897_v12 = vpack.c.bf16 %v107_v10, %v105_v9  ;;  %v174_v15 = vld [vmem:[#allocation7 + $0x30] sm:$0xff]  ;;  %v899_v16 = vpack.c.bf16 %v106_v14, %v104_v13  ;;  %v109_v17 = vld [vmem:[#allocation5 + $0x28] sm:$0xff]  ;;  %v111_v18 = vld [vmem:[#allocation5 + $0x38] sm:$0xff] }
  0x43   :  { %966 = vmatprep.subr.bf16.mxu1 %v965_v8  ;;  %v177_v19 = vld [vmem:[#allocation7 + $0x48] sm:$0xff]  ;;  %v179_v20 = vld [vmem:[#allocation7 + $0x58] sm:$0xff]  ;;  %v901_v21 = vpack.c.bf16 %v111_v18, %v109_v17  ;;  %v967_v22 = vpack.c.bf16 %v174_v15, %v172_v11  ;;  %v108_v23 = vld [vmem:[#allocation5 + $0x20] sm:$0xff] }
  0x44   :  { %898 = vmatprep.subr.bf16.mxu0 %v897_v12  ;;  %v110_v24 = vld [vmem:[#allocation5 + $0x30] sm:$0xff]  ;;  %v969_v25 = vpack.c.bf16 %v179_v20, %v177_v19  ;;  %v113_v26 = vld [vmem:[#allocation5 + $0x48] sm:$0xff]  ;;  %v115_v27 = vld [vmem:[#allocation5 + $0x58] sm:$0xff] }
  0x45   :  { %900 = vmatpush1.bf16.xpose.msra.mxu0 %v899_v16  ;;  %v903_v28 = vpack.c.bf16 %v110_v24, %v108_v23  ;;  %v905_v29 = vpack.c.bf16 %v115_v27, %v113_v26  ;;  %v176_v30 = vld [vmem:[#allocation7 + $0x40] sm:$0xff]  ;;  %v178_v31 = vld [vmem:[#allocation7 + $0x50] sm:$0xff]  ;;  %v181_v32 = vld [vmem:[#allocation7 + $0x68] sm:$0xff] }
  0x46   :  { %902 = vmatprep.subr.bf16.mxu0 %v901_v21  ;;  %v183_v33 = vld [vmem:[#allocation7 + $0x78] sm:$0xff]  ;;  %v971_v34 = vpack.c.bf16 %v178_v31, %v176_v30  ;;  %v112_v35 = vld [vmem:[#allocation5 + $0x40] sm:$0xff]  ;;  %v114_v36 = vld [vmem:[#allocation5 + $0x50] sm:$0xff] }
  0x47   :  { %v973_v37 = vpack.c.bf16 %v183_v33, %v181_v32  ;;  %v117_v38 = vld [vmem:[#allocation5 + $0x68] sm:$0xff]  ;;  %v119_v39 = vld [vmem:[#allocation5 + $0x78] sm:$0xff]  ;;  %v907_v40 = vpack.c.bf16 %v114_v36, %v112_v35  ;;  %v180_v42 = vld [vmem:[#allocation7 + $0x60] sm:$0xff] }
  0x48   :  { %v909_v41 = vpack.c.bf16 %v119_v39, %v117_v38  ;;  %v182_v43 = vld [vmem:[#allocation7 + $0x70] sm:$0xff]  ;;  %v185_v44 = vld [vmem:[#allocation7 + $0x88] sm:$0xff]  ;;  %v187_v45 = vld [vmem:[#allocation7 + $0x98] sm:$0xff] }
  0x49   :  { %v975_v46 = vpack.c.bf16 %v182_v43, %v180_v42  ;;  %v116_v47 = vld [vmem:[#allocation5 + $0x60] sm:$0xff]  ;;  %v118_v48 = vld [vmem:[#allocation5 + $0x70] sm:$0xff]  ;;  %v977_v49 = vpack.c.bf16 %v187_v45, %v185_v44  ;;  %v121_v50 = vld [vmem:[#allocation5 + $0x88] sm:$0xff] }
  0x4a   :  { %968 = vmatpush1.bf16.xpose.msra.mxu1 %v967_v22  ;;  %v123_v51 = vld [vmem:[#allocation5 + $0x98] sm:$0xff]  ;;  %v911_v52 = vpack.c.bf16 %v118_v48, %v116_v47  ;;  %v184_v54 = vld [vmem:[#allocation7 + $0x80] sm:$0xff]  ;;  %v186_v55 = vld [vmem:[#allocation7 + $0x90] sm:$0xff] }
  0x4b   :  { %970 = vmatprep.subr.bf16.mxu1 %v969_v25  ;;  %v913_v53 = vpack.c.bf16 %v123_v51, %v121_v50  ;;  %v189_v56 = vld [vmem:[#allocation7 + $0xa8] sm:$0xff]  ;;  %v191_v57 = vld [vmem:[#allocation7 + $0xb8] sm:$0xff]  ;;  %v979_v58 = vpack.c.bf16 %v186_v55, %v184_v54  ;;  %v120_v59 = vld [vmem:[#allocation5 + $0x80] sm:$0xff] }
  0x4c   :  { %v122_v60 = vld [vmem:[#allocation5 + $0x90] sm:$0xff]  ;;  %v981_v61 = vpack.c.bf16 %v191_v57, %v189_v56  ;;  %v125_v62 = vld [vmem:[#allocation5 + $0xa8] sm:$0xff]  ;;  %v127_v63 = vld [vmem:[#allocation5 + $0xb8] sm:$0xff] }
  0x4d   :  { %904 = vmatpush1.bf16.xpose.msra.mxu0 %v903_v28  ;;  %v915_v0 = vpack.c.bf16 %v122_v60, %v120_v59  ;;  %v917_v1 = vpack.c.bf16 %v127_v63, %v125_v62  ;;  %v188_v2 = vld [vmem:[#allocation7 + $0xa0] sm:$0xff]  ;;  %v190_v3 = vld [vmem:[#allocation7 + $0xb0] sm:$0xff]  ;;  %v193_v4 = vld [vmem:[#allocation7 + $0xc8] sm:$0xff] }
  0x4e   :  { %906 = vmatprep.subr.bf16.mxu0 %v905_v29  ;;  %v195_v5 = vld [vmem:[#allocation7 + $0xd8] sm:$0xff]  ;;  %v983_v6 = vpack.c.bf16 %v190_v3, %v188_v2  ;;  %v124_v7 = vld [vmem:[#allocation5 + $0xa0] sm:$0xff]  ;;  %v126_v8 = vld [vmem:[#allocation5 + $0xb0] sm:$0xff] }
  0x4f   :  { %v73_v9 = vld [vmem:[#allocation2 + $0x8] sm:$0xff]  ;;  %v985_v10 = vpack.c.bf16 %v195_v5, %v193_v4  ;;  %v131_v12 = vld [vmem:[#allocation5 + $0xd8] sm:$0xff]  ;;  %v919_v13 = vpack.c.bf16 %v126_v8, %v124_v7  ;;  %v192_v15 = vld [vmem:[#allocation7 + $0xc0] sm:$0xff] }
  0x50   :  { %v129_v11 = vld [vmem:[#allocation5 + $0xc8] sm:$0xff]  ;;  %525 = vmatprep.mubr.f32.mxu1 %v73_v9  ;;  %309 = vmatprep.mubr.f32.mxu0 %v73_v9  ;;  %v194_v16 = vld [vmem:[#allocation7 + $0xd0] sm:$0xff]  ;;  %v199_v18 = vld [vmem:[#allocation7 + $0xf8] sm:$0xff] }
  0x51   :  { %v921_v14 = vpack.c.bf16 %v131_v12, %v129_v11  ;;  %v197_v17 = vld [vmem:[#allocation7 + $0xe8] sm:$0xff]  ;;  %v987_v19 = vpack.c.bf16 %v194_v16, %v192_v15  ;;  %v128_v20 = vld [vmem:[#allocation5 + $0xc0] sm:$0xff]  ;;  %v130_v21 = vld [vmem:[#allocation5 + $0xd0] sm:$0xff] }
  0x52   :  { %972 = vmatpush1.bf16.xpose.msra.mxu1 %v971_v34  ;;  %v989_v22 = vpack.c.bf16 %v199_v18, %v197_v17  ;;  %v133_v23 = vld [vmem:[#allocation5 + $0xe8] sm:$0xff]  ;;  %v135_v24 = vld [vmem:[#allocation5 + $0xf8] sm:$0xff]  ;;  %v923_v25 = vpack.c.bf16 %v130_v21, %v128_v20  ;;  %v196_v27 = vld [vmem:[#allocation7 + $0xe0] sm:$0xff] }
  0x53   :  { %974 = vmatprep.subr.bf16.mxu1 %v973_v37  ;;  %v925_v26 = vpack.c.bf16 %v135_v24, %v133_v23  ;;  %v198_v28 = vld [vmem:[#allocation7 + $0xf0] sm:$0xff]  ;;  %v201_v29 = vld [vmem:[#allocation7 + $0x108] sm:$0xff]  ;;  %v203_v30 = vld [vmem:[#allocation7 + $0x118] sm:$0xff] }
  0x54   :  { %v991_v31 = vpack.c.bf16 %v198_v28, %v196_v27  ;;  %v132_v32 = vld [vmem:[#allocation5 + $0xe0] sm:$0xff]  ;;  %v134_v33 = vld [vmem:[#allocation5 + $0xf0] sm:$0xff]  ;;  %v993_v34 = vpack.c.bf16 %v203_v30, %v201_v29  ;;  %v137_v35 = vld [vmem:[#allocation5 + $0x108] sm:$0xff] }
  0x55   :  { %908 = vmatpush1.bf16.xpose.msra.mxu0 %v907_v40  ;;  %v139_v36 = vld [vmem:[#allocation5 + $0x118] sm:$0xff]  ;;  %v927_v37 = vpack.c.bf16 %v134_v33, %v132_v32  ;;  %v200_v39 = vld [vmem:[#allocation7 + $0x100] sm:$0xff]  ;;  %v202_v40 = vld [vmem:[#allocation7 + $0x110] sm:$0xff] }
  0x56   :  { %910 = vmatprep.subr.bf16.mxu0 %v909_v41  ;;  %v929_v38 = vpack.c.bf16 %v139_v36, %v137_v35  ;;  %v205_v41 = vld [vmem:[#allocation7 + $0x128] sm:$0xff]  ;;  %v207_v42 = vld [vmem:[#allocation7 + $0x138] sm:$0xff]  ;;  %v995_v43 = vpack.c.bf16 %v202_v40, %v200_v39  ;;  %v136_v44 = vld [vmem:[#allocation5 + $0x100] sm:$0xff] }
  0x57   :  { %v138_v45 = vld [vmem:[#allocation5 + $0x110] sm:$0xff]  ;;  %v141_v47 = vld [vmem:[#allocation5 + $0x128] sm:$0xff]  ;;  %v143_v48 = vld [vmem:[#allocation5 + $0x138] sm:$0xff] }
  0x58   :  { %v933_v50 = vpack.c.bf16 %v143_v48, %v141_v47  ;;  %v204_v51 = vld [vmem:[#allocation7 + $0x120] sm:$0xff]  ;;  %v211_v54 = vld [vmem:[#allocation7 + $0x158] sm:$0xff]  ;;  %v142_v57 = vld [vmem:[#allocation5 + $0x130] sm:$0xff] }
  0x59   :  { %v140_v56 = vld [vmem:[#allocation5 + $0x120] sm:$0xff]  ;;  %v145_v59 = vld [vmem:[#allocation5 + $0x148] sm:$0xff]  ;;  %v147_v60 = vld [vmem:[#allocation5 + $0x158] sm:$0xff] }
  0x5a   :  { %976 = vmatpush1.bf16.xpose.msra.mxu1 %v975_v46  ;;  %v997_v46 = vpack.c.bf16 %v207_v42, %v205_v41  ;;  %v937_v62 = vpack.c.bf16 %v147_v60, %v145_v59  ;;  %v208_v63 = vld [vmem:[#allocation7 + $0x140] sm:$0xff]  ;;  %v215_v2 = vld [vmem:[#allocation7 + $0x178] sm:$0xff]  ;;  %v146_v5 = vld [vmem:[#allocation5 + $0x150] sm:$0xff] }
  0x5b   :  { %978 = vmatprep.subr.bf16.mxu1 %v977_v49  ;;  %v931_v49 = vpack.c.bf16 %v138_v45, %v136_v44  ;;  %v144_v4 = vld [vmem:[#allocation5 + $0x140] sm:$0xff]  ;;  %v149_v7 = vld [vmem:[#allocation5 + $0x168] sm:$0xff]  ;;  %v151_v8 = vld [vmem:[#allocation5 + $0x178] sm:$0xff] }
  0x5c   :  { %v939_v9 = vpack.c.bf16 %v146_v5, %v144_v4  ;;  %v212_v11 = vld [vmem:[#allocation7 + $0x160] sm:$0xff]  ;;  %v214_v12 = vld [vmem:[#allocation7 + $0x170] sm:$0xff]  ;;  %v155_v20 = vld [vmem:[#allocation5 + $0x198] sm:$0xff] }
  0x5d   :  { %912 = vmatpush1.bf16.xpose.msra.mxu0 %v911_v52  ;;  %v206_v52 = vld [vmem:[#allocation7 + $0x130] sm:$0xff]  ;;  %v1007_v15 = vpack.c.bf16 %v214_v12, %v212_v11  ;;  %v148_v16 = vld [vmem:[#allocation5 + $0x160] sm:$0xff]  ;;  %v159_v32 = vld [vmem:[#allocation5 + $0x1b8] sm:$0xff] }
  0x5e   :  { %914 = vmatprep.subr.bf16.mxu0 %v913_v53  ;;  %v209_v53 = vld [vmem:[#allocation7 + $0x148] sm:$0xff]  ;;  %v999_v55 = vpack.c.bf16 %v206_v52, %v204_v51  ;;  %v150_v17 = vld [vmem:[#allocation5 + $0x170] sm:$0xff]  ;;  %v216_v23 = vld [vmem:[#allocation7 + $0x180] sm:$0xff] }
  0x5f   :  { %v943_v21 = vpack.c.bf16 %v150_v17, %v148_v16  ;;  %v218_v24 = vld [vmem:[#allocation7 + $0x190] sm:$0xff]  ;;  %v152_v28 = vld [vmem:[#allocation5 + $0x180] sm:$0xff]  ;;  %v163_v44 = vld [vmem:[#allocation5 + $0x1d8] sm:$0xff] }
  0x60   :  { %v1011_v27 = vpack.c.bf16 %v218_v24, %v216_v23  ;;  %v154_v29 = vld [vmem:[#allocation5 + $0x190] sm:$0xff]  ;;  %v220_v35 = vld [vmem:[#allocation7 + $0x1a0] sm:$0xff]  ;;  %v77_v4 = vld [vmem:[#allocation2 + $0x28] sm:$0xff] }
  0x61   :  { %v947_v33 = vpack.c.bf16 %v154_v29, %v152_v28  ;;  %v222_v36 = vld [vmem:[#allocation7 + $0x1b0] sm:$0xff]  ;;  %v156_v40 = vld [vmem:[#allocation5 + $0x1a0] sm:$0xff]  ;;  %v85_v12 = vld [vmem:[#allocation2 + $0x68] sm:$0xff] }
  0x62   :  { %980 = vmatpush1.bf16.xpose.msra.mxu1 %v979_v58  ;;  %v1001_v58 = vpack.c.bf16 %v211_v54, %v209_v53  ;;  %v1015_v39 = vpack.c.bf16 %v222_v36, %v220_v35  ;;  %v158_v41 = vld [vmem:[#allocation5 + $0x1b0] sm:$0xff]  ;;  %v224_v47 = vld [vmem:[#allocation7 + $0x1c0] sm:$0xff]  ;;  %v89_v16 = vld [vmem:[#allocation2 + $0x88] sm:$0xff] }
  0x63   :  { %982 = vmatprep.subr.bf16.mxu1 %v981_v61  ;;  %v935_v61 = vpack.c.bf16 %v142_v57, %v140_v56  ;;  %v951_v45 = vpack.c.bf16 %v158_v41, %v156_v40  ;;  %v226_v48 = vld [vmem:[#allocation7 + $0x1d0] sm:$0xff]  ;;  %v160_v52 = vld [vmem:[#allocation5 + $0x1c0] sm:$0xff]  ;;  %v167_v56 = vld [vmem:[#allocation5 + $0x1f8] sm:$0xff] }
  0x64   :  { %v1019_v51 = vpack.c.bf16 %v226_v48, %v224_v47  ;;  %v162_v53 = vld [vmem:[#allocation5 + $0x1d0] sm:$0xff]  ;;  %v228_v59 = vld [vmem:[#allocation7 + $0x1e0] sm:$0xff]  ;;  %v97_v24 = vld [vmem:[#allocation2 + $0xc8] sm:$0xff] }
  0x65   :  { %916 = vmatpush1.bf16.xpose.msra.mxu0 %v915_v0  ;;  %v210_v0 = vld [vmem:[#allocation7 + $0x150] sm:$0xff]  ;;  %v955_v57 = vpack.c.bf16 %v162_v53, %v160_v52  ;;  %v76_v5 = vld [vmem:[#allocation2 + $0x20] sm:$0xff]  ;;  %v101_v28 = vld [vmem:[#allocation2 + $0xe8] sm:$0xff] }
  0x66   :  { %918 = vmatprep.subr.bf16.mxu0 %v917_v1  ;;  %v213_v1 = vld [vmem:[#allocation7 + $0x168] sm:$0xff]  ;;  %v1003_v3 = vpack.c.bf16 %v210_v0, %v208_v63  ;;  %v230_v60 = vld [vmem:[#allocation7 + $0x1f0] sm:$0xff]  ;;  %v88_v17 = vld [vmem:[#allocation2 + $0x80] sm:$0xff] }
  0x67   :  { %v166_v63 = vld [vmem:[#allocation5 + $0x1f0] sm:$0xff]  ;;  %v100_v29 = vld [vmem:[#allocation2 + $0xe0] sm:$0xff] }
  0x68   :  { %v82_v11 = vld [vmem:[#allocation2 + $0x50] sm:$0xff]  ;;  %v449_v35 = vld [vmem:[%s1607_s4] sm:$0x3] }
  0x69   :  { %v94_v23 = vld [vmem:[#allocation2 + $0xb0] sm:$0xff] }
  0x6a   :  { %984 = vmatpush1.bf16.xpose.msra.mxu1 %v983_v6  ;;  %v1005_v6 = vpack.c.bf16 %v215_v2, %v213_v1  ;;  %v72_v1 = vld [vmem:[#allocation2] sm:$0xff]  ;;  %v75_v2 = vld [vmem:[#allocation2 + $0x18] sm:$0xff] }
  0x6b   :  { %986 = vmatprep.subr.bf16.mxu1 %v985_v10  ;;  %v941_v10 = vpack.c.bf16 %v151_v8, %v149_v7  ;;  %v78_v7 = vld [vmem:[#allocation2 + $0x30] sm:$0xff]  ;;  %v81_v8 = vld [vmem:[#allocation2 + $0x48] sm:$0xff] }
  0x6d   :  { %920 = vmatpush1.bf16.xpose.msra.mxu0 %v919_v13  ;;  %v217_v13 = vld [vmem:[#allocation7 + $0x188] sm:$0xff] }
  0x6e   :  { %922 = vmatprep.subr.bf16.mxu0 %v921_v14  ;;  %v219_v14 = vld [vmem:[#allocation7 + $0x198] sm:$0xff] }
  0x6f   :  { %v1009_v18 = vpack.c.bf16 %v219_v14, %v217_v13  ;;  %v84_v13 = vld [vmem:[#allocation2 + $0x60] sm:$0xff]  ;;  %v87_v14 = vld [vmem:[#allocation2 + $0x78] sm:$0xff] }
  0x72   :  { %988 = vmatpush1.bf16.xpose.msra.mxu1 %v987_v19  ;;  %v153_v19 = vld [vmem:[#allocation5 + $0x188] sm:$0xff] }
  0x73   :  { %990 = vmatprep.subr.bf16.mxu1 %v989_v22  ;;  %v945_v22 = vpack.c.bf16 %v155_v20, %v153_v19  ;;  %v90_v19 = vld [vmem:[#allocation2 + $0x90] sm:$0xff]  ;;  %v93_v20 = vld [vmem:[#allocation2 + $0xa8] sm:$0xff] }
  0x75   :  { %924 = vmatpush1.bf16.xpose.msra.mxu0 %v923_v25  ;;  %v221_v25 = vld [vmem:[#allocation7 + $0x1a8] sm:$0xff] }
  0x76   :  { %926 = vmatprep.subr.bf16.mxu0 %v925_v26  ;;  %v223_v26 = vld [vmem:[#allocation7 + $0x1b8] sm:$0xff] }
  0x77   :  { %v1013_v30 = vpack.c.bf16 %v223_v26, %v221_v25  ;;  %v96_v25 = vld [vmem:[#allocation2 + $0xc0] sm:$0xff]  ;;  %v99_v26 = vld [vmem:[#allocation2 + $0xd8] sm:$0xff] }
  0x7a   :  { %992 = vmatpush1.bf16.xpose.msra.mxu1 %v991_v31  ;;  %v157_v31 = vld [vmem:[#allocation5 + $0x1a8] sm:$0xff] }
  0x7b   :  { %994 = vmatprep.subr.bf16.mxu1 %v993_v34  ;;  %v949_v34 = vpack.c.bf16 %v159_v32, %v157_v31  ;;  %v102_v31 = vld [vmem:[#allocation2 + $0xf0] sm:$0xff]  ;;  %v235_v32 = vlaneseq }
  0x7d   :  { %928 = vmatpush1.bf16.xpose.msra.mxu0 %v927_v37  ;;  %v225_v37 = vld [vmem:[#allocation7 + $0x1c8] sm:$0xff] }
  0x7e   :  { %930 = vmatprep.subr.bf16.mxu0 %v929_v38  ;;  %v227_v38 = vld [vmem:[#allocation7 + $0x1d8] sm:$0xff] }
  0x7f   :  { %v1017_v42 = vpack.c.bf16 %v227_v38, %v225_v37  ;;  %v232_v37 = vld [vmem:[%s1608_s5] sm:$0x3] }
  0x82   :  { %996 = vmatpush1.bf16.xpose.msra.mxu1 %v995_v43  ;;  %v161_v43 = vld [vmem:[#allocation5 + $0x1c8] sm:$0xff] }
  0x83   :  { %998 = vmatprep.subr.bf16.mxu1 %v997_v46  ;;  %v953_v46 = vpack.c.bf16 %v163_v44, %v161_v43 }
  0x85   :  { %932 = vmatpush1.bf16.xpose.msra.mxu0 %v931_v49  ;;  %v229_v49 = vld [vmem:[#allocation7 + $0x1e8] sm:$0xff] }
  0x86   :  { %934 = vmatprep.subr.bf16.mxu0 %v933_v50  ;;  %v231_v50 = vld [vmem:[#allocation7 + $0x1f8] sm:$0xff] }
  0x87   :  { %v1021_v54 = vpack.c.bf16 %v231_v50, %v229_v49 }
  0x8a   :  { %1000 = vmatpush1.bf16.xpose.msra.mxu1 %v999_v55  ;;  %v165_v55 = vld [vmem:[#allocation5 + $0x1e8] sm:$0xff] }
  0x8b   :  { %1002 = vmatprep.subr.bf16.mxu1 %v1001_v58  ;;  %v957_v58 = vpack.c.bf16 %v167_v56, %v165_v55 }
  0x8d   :  { %936 = vmatpush1.bf16.xpose.msra.mxu0 %v935_v61  ;;  %v1023_v61 = vpack.c.bf16 %v230_v60, %v228_v59 }
  0x8e   :  { %938 = vmatprep.subr.bf16.mxu0 %v937_v62  ;;  %v164_v62 = vld [vmem:[#allocation5 + $0x1e0] sm:$0xff] }
  0x8f   :  { %v959_v0 = vpack.c.bf16 %v166_v63, %v164_v62 }
  0x92   :  { %1004 = vmatpush1.bf16.xpose.msra.mxu1 %v1003_v3  ;;  %v74_v3 = vld [vmem:[#allocation2 + $0x10] sm:$0xff] }
  0x93   :  { %1006 = vmatprep.subr.bf16.mxu1 %v1005_v6  ;;  %v79_v6 = vld [vmem:[#allocation2 + $0x38] sm:$0xff] }
  0x95   :  { %940 = vmatpush1.bf16.xpose.msra.mxu0 %v939_v9  ;;  %v80_v9 = vld [vmem:[#allocation2 + $0x40] sm:$0xff] }
  0x96   :  { %942 = vmatprep.subr.bf16.mxu0 %v941_v10  ;;  %v83_v10 = vld [vmem:[#allocation2 + $0x58] sm:$0xff] }
  0x9a   :  { %1008 = vmatpush1.bf16.xpose.msra.mxu1 %v1007_v15  ;;  %v86_v15 = vld [vmem:[#allocation2 + $0x70] sm:$0xff] }
  0x9b   :  { %1010 = vmatprep.subr.bf16.mxu1 %v1009_v18  ;;  %v91_v18 = vld [vmem:[#allocation2 + $0x98] sm:$0xff] }
  0x9d   :  { %944 = vmatpush1.bf16.xpose.msra.mxu0 %v943_v21  ;;  %v92_v21 = vld [vmem:[#allocation2 + $0xa0] sm:$0xff] }
  0x9e   :  { %946 = vmatprep.subr.bf16.mxu0 %v945_v22  ;;  %v95_v22 = vld [vmem:[#allocation2 + $0xb8] sm:$0xff] }
  0xa2   :  { %1012 = vmatpush1.bf16.xpose.msra.mxu1 %v1011_v27  ;;  %v98_v27 = vld [vmem:[#allocation2 + $0xd0] sm:$0xff] }
  0xa3   :  { %1014 = vmatprep.subr.bf16.mxu1 %v1013_v30  ;;  %v103_v30 = vld [vmem:[#allocation2 + $0xf8] sm:$0xff] }
  0xa5   :  { %948 = vmatpush1.bf16.xpose.msra.mxu0 %v947_v33  ;;  %v236_v33 = vshrl.u32 %v235_v32, 7 }
  0xa6   :  { %950 = vmatprep.subr.bf16.mxu0 %v949_v34 }
  0xa7   :  { %v237_v34 = vsub.s32 0, %v236_v33  ;;  %v241_v36 = vsub.s32 1, %v236_v33 }
  0xa9   :  { %v1291_v38 = vrot.slane %v449_v35, %v237_v34  ;;  %v1295_v40 = vrot.slane %v232_v37, %v237_v34 }
  0xaa   :  { %1016 = vmatpush1.bf16.xpose.msra.mxu1 %v1015_v39  ;;  %v1293_v39 = vrot.slane %v449_v35, %v241_v36 }
  0xab   :  { %1018 = vmatprep.subr.bf16.mxu1 %v1017_v42  ;;  %v1297_v42 = vrot.slane %v232_v37, %v241_v36 }
  0xad   :  { %952 = vmatpush1.bf16.xpose.msra.mxu0 %v951_v45  ;;  %v233_v45 = vld [vmem:[%s1606_s3] sm:$0x3]  ;;  %s1197_s3 = smov [#allocation8]  }
  0xae   :  { %954 = vmatprep.subr.bf16.mxu0 %v953_v46  ;;  %v1309_v56 = vrot.slane %v233_v45, %v241_v36  ;;  %s883_s4 = sshll.u32 %s1197_s3, 4  ;;  %s884_s4 = int_to_ptr.vmem [resolvable:$true] %s883_s4 }
  0xaf   :  { %s1164_s5 = scalar_lea.vmem %s884_s4, 4096  ;;  %p1169_p3 = scmp.lt.s32.totalorder %s884_s4, %s884_s4 }
  0xb0   :  { %p1165_p2 = scmp.ne.s32.totalorder %s884_s4, %s1164_s5  ;;  %p1170_p4 = scmp.lt.s32.totalorder %s1164_s5, %s1164_s5 }
  0xb2   :  { %1020 = vmatpush1.bf16.xpose.msra.mxu1 %v1019_v51  ;;  %v1306_v51 = vrot.slane %v233_v45, %v237_v34  ;;  %p1171_p5 = por %p1170_p4, %p1169_p3 }
  0xb3   :  { %1022 = vmatprep.subr.bf16.mxu1 %v1021_v54 }
  0xb4   :  { %p1172_p6 = pnand %p1171_p5, %p1165_p2 }
  0xb5   :  { %956 = vmatpush1.bf16.xpose.msra.mxu0 %v955_v57 }
  0xb6   :  { %958 = vmatprep.subr.bf16.mxu0 %v957_v58 }
  0xba   :  { %1024 = vmatpush1.bf16.xpose.msra.mxu1 %v1023_v61 }
  0xbd   :  { %960 = vmatpush1.bf16.xpose.msra.mxu0 %v959_v0 }
  0xc1   :  { %526 = vmatmul.mubr.f32.vlgmr.msra.gmra.mrb[0].mxu1 %v72_v1 }
  0xc2   :  { %531 = vmatprep.mubr.f32.mxu1 %v75_v2 }
  0xc4   :  { %310 = vmatmul.mubr.f32.vlgmr.msra.gmra.mrb[0].mxu0 %v72_v1 }
  0xc5   :  { %532 = vmatmul.mubr.f32.gmra.mrb[2].mxu1 %v74_v3  ;;  %315 = vmatprep.mubr.f32.mxu0 %v75_v2 }
  0xc6   :  { %537 = vmatprep.mubr.f32.mxu1 %v77_v4 }
  0xc8   :  { %316 = vmatmul.mubr.f32.gmra.mrb[2].mxu0 %v74_v3 }
  0xc9   :  { %538 = vmatmul.mubr.f32.gmra.mrb[4].mxu1 %v76_v5  ;;  %321 = vmatprep.mubr.f32.mxu0 %v77_v4 }
  0xca   :  { %543 = vmatprep.mubr.f32.mxu1 %v79_v6 }
  0xcc   :  { %322 = vmatmul.mubr.f32.gmra.mrb[4].mxu0 %v76_v5 }
  0xcd   :  { %544 = vmatmul.mubr.f32.gmra.mrb[6].mxu1 %v78_v7  ;;  %327 = vmatprep.mubr.f32.mxu0 %v79_v6 }
  0xce   :  { %549 = vmatprep.mubr.f32.mxu1 %v81_v8 }
  0xd0   :  { %328 = vmatmul.mubr.f32.gmra.mrb[6].mxu0 %v78_v7 }
  0xd1   :  { %550 = vmatmul.mubr.f32.gmra.mrb[8].mxu1 %v80_v9  ;;  %333 = vmatprep.mubr.f32.mxu0 %v81_v8 }
  0xd2   :  { %555 = vmatprep.mubr.f32.mxu1 %v83_v10 }
  0xd4   :  { %334 = vmatmul.mubr.f32.gmra.mrb[8].mxu0 %v80_v9 }
  0xd5   :  { %556 = vmatmul.mubr.f32.gmra.mrb[10].mxu1 %v82_v11  ;;  %339 = vmatprep.mubr.f32.mxu0 %v83_v10 }
  0xd6   :  { %561 = vmatprep.mubr.f32.mxu1 %v85_v12 }
  0xd8   :  { %340 = vmatmul.mubr.f32.gmra.mrb[10].mxu0 %v82_v11 }
  0xd9   :  { %562 = vmatmul.mubr.f32.gmra.mrb[12].mxu1 %v84_v13  ;;  %345 = vmatprep.mubr.f32.mxu0 %v85_v12 }
  0xda   :  { %567 = vmatprep.mubr.f32.mxu1 %v87_v14 }
  0xdc   :  { %346 = vmatmul.mubr.f32.gmra.mrb[12].mxu0 %v84_v13 }
  0xdd   :  { %568 = vmatmul.mubr.f32.gmra.mrb[14].mxu1 %v86_v15  ;;  %351 = vmatprep.mubr.f32.mxu0 %v87_v14 }
  0xde   :  { %573 = vmatprep.mubr.f32.mxu1 %v89_v16 }
  0xe0   :  { %352 = vmatmul.mubr.f32.gmra.mrb[14].mxu0 %v86_v15 }
  0xe1   :  { %574 = vmatmul.mubr.f32.gmra.mrb[16].mxu1 %v88_v17  ;;  %357 = vmatprep.mubr.f32.mxu0 %v89_v16 }
  0xe2   :  { %579 = vmatprep.mubr.f32.mxu1 %v91_v18 }
  0xe4   :  { %358 = vmatmul.mubr.f32.gmra.mrb[16].mxu0 %v88_v17 }
  0xe5   :  { %580 = vmatmul.mubr.f32.gmra.mrb[18].mxu1 %v90_v19  ;;  %363 = vmatprep.mubr.f32.mxu0 %v91_v18 }
  0xe6   :  { %585 = vmatprep.mubr.f32.mxu1 %v93_v20 }
  0xe8   :  { %364 = vmatmul.mubr.f32.gmra.mrb[18].mxu0 %v90_v19 }
  0xe9   :  { %586 = vmatmul.mubr.f32.gmra.mrb[20].mxu1 %v92_v21  ;;  %369 = vmatprep.mubr.f32.mxu0 %v93_v20 }
  0xea   :  { %591 = vmatprep.mubr.f32.mxu1 %v95_v22 }
  0xec   :  { %370 = vmatmul.mubr.f32.gmra.mrb[20].mxu0 %v92_v21 }
  0xed   :  { %592 = vmatmul.mubr.f32.gmra.mrb[22].mxu1 %v94_v23  ;;  %375 = vmatprep.mubr.f32.mxu0 %v95_v22 }
  0xee   :  { %597 = vmatprep.mubr.f32.mxu1 %v97_v24 }
  0xf0   :  { %376 = vmatmul.mubr.f32.gmra.mrb[22].mxu0 %v94_v23 }
  0xf1   :  { %598 = vmatmul.mubr.f32.gmra.mrb[24].mxu1 %v96_v25  ;;  %381 = vmatprep.mubr.f32.mxu0 %v97_v24 }
  0xf2   :  { %603 = vmatprep.mubr.f32.mxu1 %v99_v26 }
  0xf4   :  { %382 = vmatmul.mubr.f32.gmra.mrb[24].mxu0 %v96_v25 }
  0xf5   :  { %604 = vmatmul.mubr.f32.gmra.mrb[26].mxu1 %v98_v27  ;;  %387 = vmatprep.mubr.f32.mxu0 %v99_v26 }
  0xf6   :  { %609 = vmatprep.mubr.f32.mxu1 %v101_v28 }
  0xf8   :  { %388 = vmatmul.mubr.f32.gmra.mrb[26].mxu0 %v98_v27 }
  0xf9   :  { %610 = vmatmul.mubr.f32.gmra.mrb[28].mxu1 %v100_v29  ;;  %393 = vmatprep.mubr.f32.mxu0 %v101_v28 }
  0xfa   :  { %615 = vmatprep.mubr.f32.mxu1 %v103_v30 }
  0xfc   :  { %394 = vmatmul.mubr.f32.gmra.mrb[28].mxu0 %v100_v29 }
  0xfd   :  { %616 = vmatmul.mubr.f32.gmra.mrb[30].mxu1 %v102_v31  ;;  %399 = vmatprep.mubr.f32.mxu0 %v103_v30 }
 0x100   :  { %400 = vmatmul.mubr.f32.gmra.mrb[30].mxu0 %v102_v31 }
 0x194   :  { %v527_v41 = vpop.f32.mrb[0].mxu1 }
 0x195   :  { %v528_v43 = vadd.f32 %v527_v41, %v1291_v38  ;;  %v529_v44 = vpop.f32.mrb[1].mxu1 }
 0x196   :  { %v530_v46 = vadd.f32 %v529_v44, %v1293_v39 }
 0x197   :  { %v622_v47 = vmul.f32 %v528_v43, %v1295_v40  ;;  %v311_v48 = vpop.f32.mrb[0].mxu0 }
 0x198   :  { %v623_v49 = vmul.f32 %v530_v46, %v1297_v42  ;;  %v533_v50 = vpop.f32.mrb[2].mxu1  ;;  %v313_v52 = vpop.f32.mrb[1].mxu0  ;;  %v312_v63 = vadd.f32 %v311_v48, %v1306_v51 }
 0x199   :  { %v686_v53 = vmul.f32 0.70710677, %v622_v47  ;;  %v534_v54 = vadd.f32 %v533_v50, %v1291_v38  ;;  %v535_v55 = vpop.f32.mrb[3].mxu1  ;;  %v314_v4 = vadd.f32 %v313_v52, %v1309_v56  ;;  %v654_v5 = vmul.f32 0.5, %v622_v47 }
 0x19a   :  { %v687_v57 = vmul.f32 0.70710677, %v623_v49  ;;  %v536_v58 = vadd.f32 %v535_v55, %v1293_v39  ;;  %v655_v8 = vmul.f32 0.5, %v623_v49  ;;  %v417_v14 = vmul.f32 %v1295_v40, %v312_v63 }
 0x19b   :  { %1031 = verf.f32 %v686_v53  ;;  %v624_v59 = vmul.f32 %v534_v54, %v1295_v40  ;;  %v317_v60 = vpop.f32.mrb[2].mxu0  ;;  %v418_v20 = vmul.f32 %v1297_v42, %v314_v4 }
 0x19c   :  { %1033 = verf.f32 %v687_v57  ;;  %v625_v61 = vmul.f32 %v536_v58, %v1297_v42  ;;  %v539_v62 = vpop.f32.mrb[4].mxu1  ;;  %v319_v0 = vpop.f32.mrb[3].mxu0  ;;  %v318_v10 = vadd.f32 %v317_v60, %v1306_v51 }
 0x19d   :  { %v688_v1 = vmul.f32 0.70710677, %v624_v59  ;;  %v540_v2 = vadd.f32 %v539_v62, %v1291_v38  ;;  %v541_v3 = vpop.f32.mrb[5].mxu1  ;;  %v320_v15 = vadd.f32 %v319_v0, %v1309_v56  ;;  %v656_v22 = vmul.f32 0.5, %v624_v59 }
 0x19e   :  { %v689_v6 = vmul.f32 0.70710677, %v625_v61  ;;  %v542_v7 = vadd.f32 %v541_v3, %v1293_v39  ;;  %v657_v26 = vmul.f32 0.5, %v625_v61  ;;  %v419_v28 = vmul.f32 %v1295_v40, %v318_v10 }
 0x19f   :  { %1035 = verf.f32 %v688_v1  ;;  %v626_v9 = vmul.f32 %v540_v2, %v1295_v40  ;;  %v323_v11 = vpop.f32.mrb[4].mxu0  ;;  %v420_v33 = vmul.f32 %v1297_v42, %v320_v15 }
 0x1a0   :  { %1037 = verf.f32 %v689_v6  ;;  %v627_v12 = vmul.f32 %v542_v7, %v1297_v42  ;;  %v545_v13 = vpop.f32.mrb[6].mxu1  ;;  %v325_v16 = vpop.f32.mrb[5].mxu0  ;;  %v324_v21 = vadd.f32 %v323_v11, %v1306_v51 }
 0x1a1   :  { %v690_v17 = vmul.f32 0.70710677, %v626_v9  ;;  %v546_v18 = vadd.f32 %v545_v13, %v1291_v38  ;;  %v547_v19 = vpop.f32.mrb[7].mxu1  ;;  %v326_v25 = vadd.f32 %v325_v16, %v1309_v56  ;;  %v1330_v30 = vmul.f32 0.5, %v626_v9 }
 0x1a2   :  { %v691_v23 = vmul.f32 0.70710677, %v627_v12  ;;  %v548_v24 = vadd.f32 %v547_v19, %v1293_v39  ;;  %v1334_v36 = vmul.f32 0.5, %v627_v12  ;;  %v1338_v44 = vmul.f32 %v1295_v40, %v324_v21 }
 0x1a3   :  { %1039 = verf.f32 %v690_v17  ;;  %v628_v27 = vmul.f32 %v546_v18, %v1295_v40  ;;  %v329_v29 = vpop.f32.mrb[6].mxu0  ;;  %v1342_v49 = vmul.f32 %v1297_v42, %v326_v25 }
 0x1a4   :  { %1041 = verf.f32 %v691_v23  ;;  %v629_v31 = vmul.f32 %v548_v24, %v1297_v42  ;;  %v551_v32 = vpop.f32.mrb[8].mxu1  ;;  %v331_v34 = vpop.f32.mrb[7].mxu0  ;;  %v330_v53 = vadd.f32 %v329_v29, %v1306_v51 }
 0x1a5   :  { %v1032_v35 = vpop.eup %1031  ;;  %v692_v37 = vmul.f32 0.70710677, %v628_v27  ;;  %v552_v41 = vadd.f32 %v551_v32, %v1291_v38  ;;  %v553_v43 = vpop.f32.mrb[9].mxu1  ;;  %v1348_v55 = vmul.f32 0.5, %v628_v27  ;;  %v332_v2 = vadd.f32 %v331_v34, %v1309_v56 }
 0x1a6   :  { %v1034_v45 = vpop.eup %1033  ;;  %v750_v46 = vadd.f32 1.0, %v1032_v35  ;;  %v693_v47 = vmul.f32 0.70710677, %v629_v31  ;;  %v554_v48 = vadd.f32 %v553_v43, %v1293_v39  ;;  %v1355_v6 = vmul.f32 0.5, %v629_v31 }
 0x1a7   :  { %v751_v50 = vadd.f32 1.0, %v1034_v45  ;;  %1043 = verf.f32 %v692_v37  ;;  %v630_v52 = vmul.f32 %v552_v41, %v1295_v40  ;;  %v1346_v54 = vpop.f32.mrb[8].mxu0  ;;  %v423_v16 = vmul.f32 %v1295_v40, %v330_v53 }
 0x1a8   :  { %1045 = verf.f32 %v693_v47  ;;  %v782_v57 = vmul.f32 %v750_v46, %v654_v5  ;;  %v631_v58 = vmul.f32 %v554_v48, %v1297_v42  ;;  %v557_v59 = vpop.f32.mrb[10].mxu1  ;;  %v1351_v60 = vpop.f32.mrb[9].mxu0  ;;  %v424_v23 = vmul.f32 %v1297_v42, %v332_v2 }
 0x1a9   :  { %v1036_v61 = vpop.eup %1035  ;;  %v694_v62 = vmul.f32 0.70710677, %v630_v52  ;;  %v783_v63 = vmul.f32 %v751_v50, %v655_v8  ;;  %v558_v0 = vadd.f32 %v557_v59, %v1291_v38  ;;  %v559_v1 = vpop.f32.mrb[11].mxu1  ;;  %v336_v59 = vadd.f32 %v1346_v54, %v1306_v51 }
 0x1aa   :  { %v1038_v3 = vpop.eup %1037  ;;  %v752_v4 = vadd.f32 1.0, %v1036_v61  ;;  %v814_v7 = vmul.f32 %v782_v57, %v417_v14  ;;  %v695_v9 = vmul.f32 0.70710677, %v631_v58  ;;  %v560_v13 = vadd.f32 %v559_v1, %v1293_v39 }
 0x1ab   :  { %v753_v5 = vadd.f32 1.0, %v1038_v3  ;;  %1047 = verf.f32 %v694_v62  ;;  %v815_v10 = vmul.f32 %v783_v63, %v418_v20  ;;  %v632_v11 = vmul.f32 %v558_v0, %v1295_v40  ;;  %v1358_v12 = vpop.f32.mrb[10].mxu0 }
 0x1ac   :  { %846 = vst [vmem:[#allocation8] sm:$0xff] %v814_v7  ;;  %1049 = verf.f32 %v695_v9  ;;  %v784_v8 = vmul.f32 %v752_v4, %v656_v22  ;;  %v563_v15 = vpop.f32.mrb[12].mxu1  ;;  %v1362_v17 = vpop.f32.mrb[11].mxu0  ;;  %v633_v22 = vmul.f32 %v560_v13, %v1297_v42  ;;  %v663_v47 = vmul.f32 0.5, %v631_v58 }
 0x1ad   :  { %v1040_v18 = vpop.eup %1039  ;;  %847 = vst [vmem:[#allocation8 + $0x8] sm:$0xff] %v815_v10  ;;  %v696_v14 = vmul.f32 0.70710677, %v632_v11  ;;  %v785_v19 = vmul.f32 %v753_v5, %v657_v26  ;;  %v564_v20 = vadd.f32 %v563_v15, %v1291_v38  ;;  %v565_v21 = vpop.f32.mrb[13].mxu1  ;;  %v662_v26 = vmul.f32 0.5, %v630_v52 }
 0x1ae   :  { %v1042_v24 = vpop.eup %1041  ;;  %v754_v25 = vadd.f32 1.0, %v1040_v18  ;;  %v816_v27 = vmul.f32 %v784_v8, %v419_v28  ;;  %v566_v29 = vadd.f32 %v565_v21, %v1293_v39  ;;  %v697_v37 = vmul.f32 0.70710677, %v633_v22 }
 0x1af   :  { %v755_v31 = vadd.f32 1.0, %v1042_v24  ;;  %1051 = verf.f32 %v696_v14  ;;  %v817_v32 = vmul.f32 %v785_v19, %v420_v33  ;;  %v634_v34 = vmul.f32 %v564_v20, %v1295_v40  ;;  %v1369_v35 = vpop.f32.mrb[12].mxu0 }
 0x1b0   :  { %848 = vst [vmem:[#allocation8 + $0x10] sm:$0xff] %v816_v27  ;;  %v786_v41 = vmul.f32 %v754_v25, %v1330_v30  ;;  %v1373_v43 = vmul.f32 %v566_v29, %v1297_v42  ;;  %v569_v28 = vpop.f32.mrb[14].mxu1  ;;  %v1375_v45 = vpop.f32.mrb[13].mxu0  ;;  %1053 = verf.f32 %v697_v37  ;;  %v338_v7 = vadd.f32 %v1351_v60, %v1309_v56 }
 0x1b1   :  { %v1044_v46 = vpop.eup %1043  ;;  %849 = vst [vmem:[#allocation8 + $0x18] sm:$0xff] %v817_v32  ;;  %v698_v48 = vmul.f32 0.70710677, %v634_v34  ;;  %v787_v33 = vmul.f32 %v755_v31, %v1334_v36  ;;  %v570_v50 = vadd.f32 %v569_v28, %v1291_v38  ;;  %v571_v53 = vpop.f32.mrb[15].mxu1  ;;  %v664_v36 = vmul.f32 0.5, %v632_v11 }
 0x1b2   :  { %v1046_v52 = vpop.eup %1045  ;;  %v756_v57 = vadd.f32 1.0, %v1044_v46  ;;  %v818_v30 = vmul.f32 %v786_v41, %v1338_v44  ;;  %v699_v58 = vmul.f32 0.70710677, %v1373_v43  ;;  %v572_v44 = vadd.f32 %v571_v53, %v1293_v39 }
 0x1b3   :  { %v757_v61 = vadd.f32 1.0, %v1046_v52  ;;  %1055 = verf.f32 %v698_v48  ;;  %v819_v62 = vmul.f32 %v787_v33, %v1342_v49  ;;  %v1384_v63 = vpop.f32.mrb[14].mxu0  ;;  %v1388_v1 = vmul.f32 %v570_v50, %v1295_v40 }
 0x1b4   :  { %850 = vst [vmem:[#allocation8 + $0x20] sm:$0xff] %v818_v30  ;;  %v788_v0 = vmul.f32 %v756_v57, %v1348_v55  ;;  %v575_v2 = vpop.f32.mrb[16].mxu1  ;;  %v1391_v3 = vpop.f32.mrb[15].mxu0  ;;  %1057 = verf.f32 %v699_v58  ;;  %v425_v8 = vmul.f32 %v1295_v40, %v336_v59  ;;  %v1400_v18 = vmul.f32 %v572_v44, %v1297_v42 }
 0x1b5   :  { %v1048_v54 = vpop.eup %1047  ;;  %851 = vst [vmem:[#allocation8 + $0x28] sm:$0xff] %v819_v62  ;;  %v789_v49 = vmul.f32 %v757_v61, %v1355_v6  ;;  %v576_v4 = vadd.f32 %v575_v2, %v1291_v38  ;;  %v577_v9 = vpop.f32.mrb[17].mxu1  ;;  %v700_v11 = vmul.f32 0.70710677, %v1388_v1  ;;  %v426_v19 = vmul.f32 %v1297_v42, %v338_v7 }
 0x1b6   :  { %v1050_v55 = vpop.eup %1049  ;;  %v758_v5 = vadd.f32 1.0, %v1048_v54  ;;  %v820_v10 = vmul.f32 %v788_v0, %v423_v16  ;;  %v578_v16 = vadd.f32 %v577_v9, %v1293_v39  ;;  %v666_v25 = vmul.f32 0.5, %v634_v34 }
 0x1b7   :  { %v759_v13 = vadd.f32 1.0, %v1050_v55  ;;  %v821_v15 = vmul.f32 %v789_v49, %v424_v23  ;;  %v1403_v6 = vmul.f32 %v576_v4, %v1295_v40  ;;  %v1405_v14 = vpop.f32.mrb[16].mxu0  ;;  %1059 = verf.f32 %v700_v11 }
 0x1b8   :  { %852 = vst [vmem:[#allocation8 + $0x30] sm:$0xff] %v820_v10  ;;  %v790_v60 = vmul.f32 %v758_v5, %v662_v26  ;;  %v581_v20 = vpop.f32.mrb[18].mxu1  ;;  %v1409_v21 = vpop.f32.mrb[17].mxu0  ;;  %v665_v23 = vmul.f32 0.5, %v633_v22  ;;  %v701_v27 = vmul.f32 0.70710677, %v1400_v18  ;;  %v1414_v26 = vmul.f32 %v578_v16, %v1297_v42 }
 0x1b9   :  { %v1052_v24 = vpop.eup %1051  ;;  %853 = vst [vmem:[#allocation8 + $0x38] sm:$0xff] %v821_v15  ;;  %v702_v29 = vmul.f32 0.70710677, %v1403_v6  ;;  %v791_v37 = vmul.f32 %v759_v13, %v663_v47  ;;  %v583_v41 = vpop.f32.mrb[19].mxu1  ;;  %v342_v28 = vadd.f32 %v1358_v12, %v1306_v51  ;;  %v582_v46 = vadd.f32 %v581_v20, %v1291_v38 }
 0x1ba   :  { %v760_v31 = vadd.f32 1.0, %v1052_v24  ;;  %v822_v32 = vmul.f32 %v790_v60, %v425_v8  ;;  %1061 = verf.f32 %v701_v27  ;;  %v344_v22 = vadd.f32 %v1362_v17, %v1309_v56  ;;  %v1054_v48 = vpop.eup %1053 }
 0x1bb   :  { %v1421_v34 = vpop.f32.mrb[18].mxu0  ;;  %v667_v33 = vmul.f32 0.5, %v1373_v43  ;;  %1063 = verf.f32 %v702_v29  ;;  %v823_v47 = vmul.f32 %v791_v37, %v426_v19  ;;  %v703_v50 = vmul.f32 0.70710677, %v1414_v26 }
 0x1bc   :  { %854 = vst [vmem:[#allocation8 + $0x40] sm:$0xff] %v822_v32  ;;  %v587_v53 = vpop.f32.mrb[20].mxu1  ;;  %v1425_v52 = vpop.f32.mrb[19].mxu0  ;;  %v761_v12 = vadd.f32 1.0, %v1054_v48  ;;  %v427_v30 = vmul.f32 %v1295_v40, %v342_v28  ;;  %v792_v59 = vmul.f32 %v760_v31, %v664_v36  ;;  %v640_v17 = vmul.f32 %v582_v46, %v1295_v40 }
 0x1bd   :  { %v1056_v57 = vpop.eup %1055  ;;  %v589_v61 = vpop.f32.mrb[21].mxu1  ;;  %855 = vst [vmem:[#allocation8 + $0x48] sm:$0xff] %v823_v47  ;;  %1065 = verf.f32 %v703_v50  ;;  %v428_v43 = vmul.f32 %v1297_v42, %v344_v22  ;;  %v584_v58 = vadd.f32 %v583_v41, %v1293_v39  ;;  %v668_v44 = vmul.f32 0.5, %v1388_v1 }
 0x1be   :  { %v762_v62 = vadd.f32 1.0, %v1056_v57  ;;  %v1058_v0 = vpop.eup %1057  ;;  %v824_v2 = vmul.f32 %v792_v59, %v427_v30  ;;  %v704_v54 = vmul.f32 0.70710677, %v640_v17  ;;  %v793_v49 = vmul.f32 %v761_v12, %v665_v23 }
 0x1bf   :  { %v1432_v4 = vpop.f32.mrb[20].mxu0  ;;  %v763_v7 = vadd.f32 1.0, %v1058_v0  ;;  %v1435_v36 = vmul.f32 %v584_v58, %v1297_v42  ;;  %v348_v9 = vadd.f32 %v1369_v35, %v1306_v51  ;;  %v588_v1 = vadd.f32 %v587_v53, %v1291_v38 }
 0x1c0   :  { %v794_v55 = vmul.f32 %v762_v62, %v666_v25  ;;  %v593_v5 = vpop.f32.mrb[22].mxu1  ;;  %v1439_v10 = vpop.f32.mrb[21].mxu0  ;;  %856 = vst [vmem:[#allocation8 + $0x50] sm:$0xff] %v824_v2  ;;  %1067 = verf.f32 %v704_v54  ;;  %v825_v11 = vmul.f32 %v793_v49, %v428_v43  ;;  %v350_v8 = vadd.f32 %v1375_v45, %v1309_v56 }
 0x1c1   :  { %v595_v13 = vpop.f32.mrb[23].mxu1  ;;  %v1060_v15 = vpop.eup %1059  ;;  %v669_v60 = vmul.f32 0.5, %v1400_v18  ;;  %v705_v19 = vmul.f32 0.70710677, %v1435_v36  ;;  %v429_v35 = vmul.f32 %v1295_v40, %v348_v9  ;;  %v795_v16 = vmul.f32 %v763_v7, %v667_v33 }
 0x1c2   :  { %v764_v20 = vadd.f32 1.0, %v1060_v15  ;;  %857 = vst [vmem:[#allocation8 + $0x58] sm:$0xff] %v825_v11  ;;  %v1448_v24 = vmul.f32 %v588_v1, %v1295_v40  ;;  %v430_v23 = vmul.f32 %v1297_v42, %v350_v8  ;;  %v590_v25 = vadd.f32 %v589_v61, %v1293_v39 }
 0x1c3   :  { %v1452_v27 = vpop.f32.mrb[22].mxu0  ;;  %1069 = verf.f32 %v705_v19  ;;  %v826_v45 = vmul.f32 %v794_v55, %v429_v35  ;;  %v354_v18 = vadd.f32 %v1384_v63, %v1306_v51  ;;  %v594_v29 = vadd.f32 %v593_v5, %v1291_v38 }
 0x1c4   :  { %v599_v31 = vpop.f32.mrb[24].mxu1  ;;  %v1457_v32 = vpop.f32.mrb[23].mxu0  ;;  %v670_v41 = vmul.f32 0.5, %v1403_v6  ;;  %v706_v28 = vmul.f32 0.70710677, %v1448_v24  ;;  %v827_v46 = vmul.f32 %v795_v16, %v430_v23  ;;  %v1462_v22 = vmul.f32 %v590_v25, %v1297_v42 }
 0x1c5   :  { %v1062_v37 = vpop.eup %1061  ;;  %v601_v48 = vpop.f32.mrb[25].mxu1  ;;  %858 = vst [vmem:[#allocation8 + $0x60] sm:$0xff] %v826_v45  ;;  %v431_v63 = vmul.f32 %v1295_v40, %v354_v18  ;;  %v796_v50 = vmul.f32 %v764_v20, %v668_v44  ;;  %v1466_v53 = vmul.f32 %v594_v29, %v1295_v40  ;;  %v671_v12 = vmul.f32 0.5, %v1414_v26 }
 0x1c6   :  { %v1064_v33 = vpop.eup %1063  ;;  %v765_v47 = vadd.f32 1.0, %v1062_v37  ;;  %1071 = verf.f32 %v706_v28  ;;  %859 = vst [vmem:[#allocation8 + $0x68] sm:$0xff] %v827_v46  ;;  %v707_v6 = vmul.f32 0.70710677, %v1462_v22  ;;  %v672_v61 = vmul.f32 0.5, %v640_v17 }
 0x1c7   :  { %v766_v57 = vadd.f32 1.0, %v1064_v33  ;;  %v1470_v30 = vpop.f32.mrb[24].mxu0  ;;  %v1066_v59 = vpop.eup %1065  ;;  %v828_v62 = vmul.f32 %v796_v50, %v431_v63  ;;  %v708_v43 = vmul.f32 0.70710677, %v1466_v53  ;;  %v356_v58 = vadd.f32 %v1391_v3, %v1309_v56 }
 0x1c8   :  { %v605_v0 = vpop.f32.mrb[26].mxu1  ;;  %v1475_v44 = vpop.f32.mrb[25].mxu0  ;;  %v767_v2 = vadd.f32 1.0, %v1066_v59  ;;  %1073 = verf.f32 %v707_v6  ;;  %v797_v26 = vmul.f32 %v765_v47, %v669_v60  ;;  %v596_v54 = vadd.f32 %v595_v13, %v1293_v39 }
 0x1c9   :  { %v607_v49 = vpop.f32.mrb[27].mxu1  ;;  %860 = vst [vmem:[#allocation8 + $0x70] sm:$0xff] %v828_v62  ;;  %1075 = verf.f32 %v708_v43  ;;  %v432_v7 = vmul.f32 %v1297_v42, %v356_v58  ;;  %v360_v17 = vadd.f32 %v1405_v14, %v1306_v51  ;;  %v798_v9 = vmul.f32 %v766_v57, %v670_v41 }
 0x1ca   :  { %v1068_v55 = vpop.eup %1067  ;;  %v1482_v3 = vmul.f32 %v596_v54, %v1297_v42  ;;  %v600_v5 = vadd.f32 %v599_v31, %v1291_v38  ;;  %v362_v11 = vadd.f32 %v1409_v21, %v1309_v56  ;;  %v799_v1 = vmul.f32 %v767_v2, %v671_v12 }
 0x1cb   :  { %v1487_v8 = vpop.f32.mrb[26].mxu0  ;;  %v768_v13 = vadd.f32 1.0, %v1068_v55  ;;  %v829_v15 = vmul.f32 %v797_v26, %v432_v7  ;;  %v433_v60 = vmul.f32 %v1295_v40, %v360_v17  ;;  %v602_v19 = vadd.f32 %v601_v48, %v1293_v39 }
 0x1cc   :  { %v611_v14 = vpop.f32.mrb[28].mxu1  ;;  %v1491_v35 = vpop.f32.mrb[27].mxu0  ;;  %v709_v16 = vmul.f32 0.70710677, %v1482_v3  ;;  %v1495_v20 = vmul.f32 %v600_v5, %v1295_v40  ;;  %v434_v23 = vmul.f32 %v1297_v42, %v362_v11  ;;  %v366_v29 = vadd.f32 %v1421_v34, %v1306_v51 }
 0x1cd   :  { %v613_v21 = vpop.f32.mrb[29].mxu1  ;;  %v1070_v25 = vpop.eup %1069  ;;  %861 = vst [vmem:[#allocation8 + $0x78] sm:$0xff] %v829_v15  ;;  %v830_v45 = vmul.f32 %v798_v9, %v433_v60  ;;  %v1499_v18 = vmul.f32 %v602_v19, %v1297_v42  ;;  %v800_v31 = vmul.f32 %v768_v13, %v672_v61  ;;  %v673_v37 = vmul.f32 0.5, %v1435_v36 }
 0x1ce   :  { %v769_v41 = vadd.f32 1.0, %v1070_v25  ;;  %1077 = verf.f32 %v709_v16  ;;  %v710_v28 = vmul.f32 0.70710677, %v1495_v20  ;;  %v674_v48 = vmul.f32 0.5, %v1448_v24 }
 0x1cf   :  { %v1505_v46 = vpop.f32.mrb[28].mxu0  ;;  %862 = vst [vmem:[#allocation8 + $0x80] sm:$0xff] %v830_v45  ;;  %v831_v33 = vmul.f32 %v799_v1, %v434_v23  ;;  %v711_v47 = vmul.f32 0.70710677, %v1499_v18  ;;  %v435_v63 = vmul.f32 %v1295_v40, %v366_v29  ;;  %v606_v36 = vadd.f32 %v605_v0, %v1291_v38 }
 0x1d0   :  { %v617_v50 = vpop.f32.mrb[30].mxu1  ;;  %v1510_v57 = vpop.f32.mrb[29].mxu0  ;;  %1079 = verf.f32 %v710_v28  ;;  %v368_v12 = vadd.f32 %v1425_v52, %v1309_v56  ;;  %v801_v6 = vmul.f32 %v769_v41, %v673_v37  ;;  %v608_v62 = vadd.f32 %v607_v49, %v1293_v39 }
 0x1d1   :  { %v1072_v34 = vpop.eup %1071  ;;  %v619_v59 = vpop.f32.mrb[31].mxu1  ;;  %863 = vst [vmem:[#allocation8 + $0x88] sm:$0xff] %v831_v33  ;;  %1081 = verf.f32 %v711_v47  ;;  %v832_v24 = vmul.f32 %v800_v31, %v435_v63  ;;  %v1517_v58 = vmul.f32 %v606_v36, %v1295_v40  ;;  %v372_v0 = vadd.f32 %v1432_v4, %v1306_v51 }
 0x1d2   :  { %v770_v61 = vadd.f32 1.0, %v1072_v34  ;;  %v1074_v43 = vpop.eup %1073  ;;  %v436_v2 = vmul.f32 %v1297_v42, %v368_v12  ;;  %v612_v26 = vadd.f32 %v611_v14, %v1291_v38  ;;  %v1526_v17 = vmul.f32 %v608_v62, %v1297_v42 }
 0x1d3   :  { %v1523_v52 = vpop.f32.mrb[30].mxu0  ;;  %v1076_v54 = vpop.eup %1075  ;;  %v771_v7 = vadd.f32 1.0, %v1074_v43  ;;  %864 = vst [vmem:[#allocation8 + $0x90] sm:$0xff] %v832_v24  ;;  %v374_v9 = vadd.f32 %v1439_v10, %v1309_v56  ;;  %v675_v5 = vmul.f32 0.5, %v1462_v22  ;;  %v712_v4 = vmul.f32 0.70710677, %v1517_v58 }
 0x1d4   :  { %v802_v49 = vmul.f32 %v770_v61, %v674_v48  ;;  %v1530_v55 = vpop.f32.mrb[31].mxu0  ;;  %v772_v11 = vadd.f32 1.0, %v1076_v54  ;;  %v833_v1 = vmul.f32 %v801_v6, %v436_v2  ;;  %v676_v13 = vmul.f32 0.5, %v1466_v53 }
 0x1d5   :  { %v713_v15 = vmul.f32 0.70710677, %v1526_v17  ;;  %v437_v60 = vmul.f32 %v1295_v40, %v372_v0  ;;  %v1538_v19 = vmul.f32 %v612_v26, %v1295_v40  ;;  %1083 = verf.f32 %v712_v4 }
 0x1d6   :  { %865 = vst [vmem:[#allocation8 + $0x98] sm:$0xff] %v833_v1  ;;  %v438_v10 = vmul.f32 %v1297_v42, %v374_v9  ;;  %v803_v14 = vmul.f32 %v771_v7, %v675_v5  ;;  %v614_v22 = vadd.f32 %v613_v21, %v1293_v39  ;;  %v677_v16 = vmul.f32 0.5, %v1482_v3 }
 0x1d7   :  { %1085 = verf.f32 %v713_v15  ;;  %v834_v23 = vmul.f32 %v802_v49, %v437_v60  ;;  %v714_v53 = vmul.f32 0.70710677, %v1538_v19  ;;  %v378_v31 = vadd.f32 %v1452_v27, %v1306_v51 }
 0x1d8   :  { %v1078_v25 = vpop.eup %1077  ;;  %v835_v45 = vmul.f32 %v803_v14, %v438_v10  ;;  %v1545_v29 = vmul.f32 %v614_v22, %v1297_v42  ;;  %v804_v37 = vmul.f32 %v772_v11, %v676_v13  ;;  %v618_v21 = vadd.f32 %v617_v50, %v1291_v38 }
 0x1d9   :  { %v773_v41 = vadd.f32 1.0, %v1078_v25  ;;  %866 = vst [vmem:[#allocation8 + $0xa0] sm:$0xff] %v834_v23  ;;  %1087 = verf.f32 %v714_v53  ;;  %v380_v3 = vadd.f32 %v1457_v32, %v1309_v56  ;;  %v678_v48 = vmul.f32 0.5, %v1495_v20 }
 0x1da   :  { %v1080_v28 = vpop.eup %1079  ;;  %867 = vst [vmem:[#allocation8 + $0xa8] sm:$0xff] %v835_v45  ;;  %v715_v33 = vmul.f32 0.70710677, %v1545_v29  ;;  %v439_v47 = vmul.f32 %v1295_v40, %v378_v31  ;;  %v620_v63 = vadd.f32 %v619_v59, %v1293_v39  ;;  %v652_v36 = vmul.f32 %v618_v21, %v1295_v40 }
 0x1db   :  { %v1082_v27 = vpop.eup %1081  ;;  %v774_v34 = vadd.f32 1.0, %v1080_v28  ;;  %v440_v12 = vmul.f32 %v1297_v42, %v380_v3  ;;  %v805_v38 = vmul.f32 %v773_v41, %v677_v16  ;;  %v679_v20 = vmul.f32 0.5, %v1499_v18 }
 0x1dc   :  { %v775_v50 = vadd.f32 1.0, %v1082_v27  ;;  %1089 = verf.f32 %v715_v33  ;;  %v836_v32 = vmul.f32 %v804_v37, %v439_v47  ;;  %v653_v6 = vmul.f32 %v620_v63, %v1297_v42 }
 0x1dd   :  { %v716_v61 = vmul.f32 0.70710677, %v652_v36  ;;  %v837_v24 = vmul.f32 %v805_v38, %v440_v12  ;;  %v384_v62 = vadd.f32 %v1470_v30, %v1306_v51  ;;  %v806_v59 = vmul.f32 %v774_v34, %v678_v48 }
 0x1de   :  { %868 = vst [vmem:[#allocation8 + $0xb0] sm:$0xff] %v836_v32  ;;  %v717_v39 = vmul.f32 0.70710677, %v653_v6  ;;  %v386_v43 = vadd.f32 %v1475_v44, %v1309_v56  ;;  %v807_v0 = vmul.f32 %v775_v50, %v679_v20  ;;  %v390_v26 = vadd.f32 %v1487_v8, %v1306_v51 }
 0x1df   :  { %1091 = verf.f32 %v716_v61  ;;  %869 = vst [vmem:[#allocation8 + $0xb8] sm:$0xff] %v837_v24  ;;  %v441_v2 = vmul.f32 %v1295_v40, %v384_v62  ;;  %v1084_v18 = vpop.eup %1083  ;;  %v392_v30 = vadd.f32 %v1491_v35, %v1309_v56  ;;  %v396_v7 = vadd.f32 %v1505_v46, %v1306_v51 }
 0x1e0   :  { %1093 = verf.f32 %v717_v39  ;;  %v442_v54 = vmul.f32 %v1297_v42, %v386_v43  ;;  %v680_v44 = vmul.f32 0.5, %v1517_v58  ;;  %v776_v9 = vadd.f32 1.0, %v1084_v18 }
 0x1e1   :  { %v1086_v49 = vpop.eup %1085  ;;  %v838_v5 = vmul.f32 %v806_v59, %v441_v2  ;;  %v443_v11 = vmul.f32 %v1295_v40, %v390_v26  ;;  %v681_v4 = vmul.f32 0.5, %v1526_v17  ;;  %v444_v13 = vmul.f32 %v1297_v42, %v392_v30 }
 0x1e2   :  { %v777_v8 = vadd.f32 1.0, %v1086_v49  ;;  %v839_v1 = vmul.f32 %v807_v0, %v442_v54  ;;  %v808_v60 = vmul.f32 %v776_v9, %v680_v44  ;;  %v398_v35 = vadd.f32 %v1510_v57, %v1309_v56 }
 0x1e3   :  { %v1088_v15 = vpop.eup %1087  ;;  %870 = vst [vmem:[#allocation8 + $0xc0] sm:$0xff] %v838_v5  ;;  %v682_v46 = vmul.f32 0.5, %v1538_v19  ;;  %v445_v14 = vmul.f32 %v1295_v40, %v396_v7  ;;  %v402_v53 = vadd.f32 %v1523_v52, %v1306_v51  ;;  %v683_v25 = vmul.f32 0.5, %v1545_v29 }
 0x1e4   :  { %v778_v10 = vadd.f32 1.0, %v1088_v15  ;;  %871 = vst [vmem:[#allocation8 + $0xc8] sm:$0xff] %v839_v1  ;;  %v809_v58 = vmul.f32 %v777_v8, %v681_v4  ;;  %v840_v22 = vmul.f32 %v808_v60, %v443_v11  ;;  %v446_v57 = vmul.f32 %v1297_v42, %v398_v35 }
 0x1e5   :  { %v404_v19 = vadd.f32 %v1530_v55, %v1309_v56  ;;  %v684_v3 = vmul.f32 0.5, %v652_v36  ;;  %v447_v48 = vmul.f32 %v1295_v40, %v402_v53  ;;  %v685_v51 = vmul.f32 0.5, %v653_v6 }
 0x1e6   :  { %v1090_v16 = vpop.eup %1089  ;;  %v841_v17 = vmul.f32 %v809_v58, %v444_v13  ;;  %v810_v23 = vmul.f32 %v778_v10, %v682_v46  ;;  %872 = vst [vmem:[#allocation8 + $0xd0] sm:$0xff] %v840_v22 }
 0x1e7   :  { %v779_v45 = vadd.f32 1.0, %v1090_v16  ;;  %v448_v33 = vmul.f32 %v1297_v42, %v404_v19 }
 0x1e8   :  { %873 = vst [vmem:[#allocation8 + $0xd8] sm:$0xff] %v841_v17  ;;  %v842_v31 = vmul.f32 %v810_v23, %v445_v14 }
 0x1e9   :  { %v1092_v37 = vpop.eup %1091  ;;  %v811_v41 = vmul.f32 %v779_v45, %v683_v25 }
 0x1ea   :  { %v1094_v21 = vpop.eup %1093  ;;  %v780_v28 = vadd.f32 1.0, %v1092_v37  ;;  %874 = vst [vmem:[#allocation8 + $0xe0] sm:$0xff] %v842_v31 }
 0x1eb   :  { %v781_v52 = vadd.f32 1.0, %v1094_v21  ;;  %v843_v29 = vmul.f32 %v811_v41, %v446_v57 }
 0x1ec   :  { %v812_v47 = vmul.f32 %v780_v28, %v684_v3 }
 0x1ed   :  { %875 = vst [vmem:[#allocation8 + $0xe8] sm:$0xff] %v843_v29  ;;  %v813_v56 = vmul.f32 %v781_v52, %v685_v51 }
 0x1ee   :  { %v844_v55 = vmul.f32 %v812_v47, %v447_v48 }
 0x1ef   :  { %v845_v63 = vmul.f32 %v813_v56, %v448_v33 }
 0x1f0   :  { %876 = vst [vmem:[#allocation8 + $0xf0] sm:$0xff] %v844_v55 }
 0x1f1   :  { %877 = vst [vmem:[#allocation8 + $0xf8] sm:$0xff] %v845_v63 }
 0x1f2   :  { %1175 = shalt.err (!%p1172_p6)
}
 0x1f3   :  { %s1176_s20 = scalar_lea.hbm %s1609_s6, 4096 }
 0x1f4   :  { %p1177_p7 = scmp.ne.s32.totalorder %s1609_s6, %s1176_s20  ;;  %p1180_p8 = scmp.lt.u32.totalorder %s1176_s20, %s1609_s6 }
 0x1f6   :  { %p1182_p9 = pnand %p1180_p8, %p1177_p7 }
 0x1f8   :  { %1185 = shalt.err (!%p1182_p9)
}
 0x1f9   :  { %889 = dma.vmem_to_hbm [thread:$0]  %s884_s4, 4096, %s1609_s6, [#allocation4], %s1194_s12, %s1194_s12, %s1195_s13  }
 0x1fa   :  { %1190 = dma.done.wait [#allocation4], 4096  }
 0x1fb   :  { %1191 = vsyncadd [#allocation4], 4294963200 }
 0x1fc   :  { %893 = vsyncpa [#allocation3], 1 }
 0x1fd   :  { %894 = vsyncpa [#allocation6], 1 }
 0x1fe   :  { %895 = vsyncpa [#allocation4], 1 }

</bundles_post_ra>
